<compile_context>
chip_gen: v7x
topology: tpu7x:2x2x1
jax: 0.10.0
libtpu: 0.0.40
codegen_flags: <defaults>
</compile_context>

<pallas_src>
import functools

import jax
import jax.numpy as jnp
from jax.experimental import pallas as pl
from jax.experimental.pallas import tpu as pltpu

HEAD_PAD = 128   # lane-dense width for padded hidden dim and fused head output
TB_MAX = 2048    # max batch tile (amortizes ~0.35 us/step pipeline overhead)


def _policy_kernel(x_ref, w1_ref, b1_ref, w2_ref, b2_ref, wh_ref, bh_ref,
                   out_ref, *, action_dim):
    # Biases loaded once per batch tile (f32). MXU inputs may be bf16; all
    # accumulation and element-wise math (tanh / exp / softmax) is f32.
    b1 = b1_ref[...]
    b2 = b2_ref[...]
    bh = bh_ref[...]

    x = x_ref[...].astype(w1_ref.dtype)
    h1 = jnp.tanh(jnp.dot(x, w1_ref[...], preferred_element_type=jnp.float32) + b1)
    h2 = jnp.tanh(jnp.dot(h1.astype(w2_ref.dtype), w2_ref[...],
                          preferred_element_type=jnp.float32) + b2)

    # Fused head: one 128-lane matmul produces action logits + state value.
    head = jnp.dot(h2.astype(wh_ref.dtype), wh_ref[...],
                   preferred_element_type=jnp.float32) + bh

    # Lane masks from a single (1, HEAD_PAD) iota, broadcast over the tile.
    col = jax.lax.broadcasted_iota(jnp.int32, (1, HEAD_PAD), 1)
    is_action = col < action_dim
    is_value = col == action_dim

    # Numerically stable softmax over the first `action_dim` lanes only.
    # Exact divide so rows sum to 1 (safe for log-prob / entropy consumers).
    logits = jnp.where(is_action, head, jnp.float32(-1e30))
    m = jnp.max(logits, axis=-1, keepdims=True)
    e = jnp.exp(logits - m)
    denom = jnp.sum(e, axis=-1, keepdims=True)
    probs = e / denom

    # Lane-dense combined output: probs in [0, A), value in lane A, zeros after.
    out_ref[...] = jnp.where(is_action, probs,
                             jnp.where(is_value, head, 0.0)).astype(out_ref.dtype)


def _round_up(n, m):
    return ((n + m - 1) // m) * m


@functools.partial(jax.jit, static_argnames=("action_dim",))
def policy_network_forward(x, params, *, action_dim):
    """x: (batch, state_dim); params from pad_and_fuse_params.
    Returns (action_probs (batch, action_dim), state_values (batch, 1))."""
    batch, state_dim = x.shape
    use_bf16 = params["w1"].dtype == jnp.bfloat16
    out_dtype = jnp.bfloat16 if use_bf16 else jnp.float32

    # Batch tile: big enough to amortize per-step pipeline overhead, capped at
    # TB_MAX, and sized so large batches always get >= 2 grid steps (v7x's two
    # TensorCores both get work via the "parallel" batch axis). Multiple of 16
    # (bf16 sublane friendly). No padding of x: the last grid step simply gets
    # a partial block; out-of-bounds output rows are masked by Pallas and the
    # per-row math never mixes rows.
    if batch <= 16:
        tb = batch
    else:
        tb = min(TB_MAX, _round_up(pl.cdiv(batch, 2), 16))
    grid = (pl.cdiv(batch, tb),)

    kernel = functools.partial(_policy_kernel, action_dim=action_dim)
    resident = lambda i: (0, 0)  # weights/biases: same block every iteration

    out = pl.pallas_call(
        kernel,
        out_shape=jax.ShapeDtypeStruct((batch, HEAD_PAD), out_dtype),
        grid=grid,
        in_specs=[
            pl.BlockSpec((tb, state_dim), lambda i: (i, 0)),
            pl.BlockSpec(params["w1"].shape, resident),
            pl.BlockSpec(params["b1"].shape, resident),
            pl.BlockSpec(params["w2"].shape, resident),
            pl.BlockSpec(params["b2"].shape, resident),
            pl.BlockSpec(params["wh"].shape, resident),
            pl.BlockSpec(params["bh"].shape, resident),
        ],
        out_specs=pl.BlockSpec((tb, HEAD_PAD), lambda i: (i, 0)),
        compiler_params=pltpu.CompilerParams(
            dimension_semantics=("parallel",),
            vmem_limit_bytes=32 * 1024 * 1024,
        ),
    )(x, params["w1"], params["b1"], params["w2"], params["b2"],
      params["wh"], params["bh"])

    # One narrow slice (single pass over the wide buffer), then cheap splits.
    head = out[:, :action_dim + 1].astype(jnp.float32)
    probs = head[:, :action_dim]
    values = head[:, action_dim:action_dim + 1]
    return probs, values


def init_params(key, state_dim, action_dim, hidden_dim=64):
    """Raw params with PyTorch nn.Linear default init; weights as (in, out)."""
    def linear(k, fan_in, fan_out):
        kw, kb = jax.random.split(k)
        bound = 1.0 / jnp.sqrt(jnp.float32(fan_in))
        w = jax.random.uniform(kw, (fan_in, fan_out), jnp.float32, -bound, bound)
        b = jax.random.uniform(kb, (1, fan_out), jnp.float32, -bound, bound)
        return w, b

    k1, k2, k3, k4 = jax.random.split(key, 4)
    w1, b1 = linear(k1, state_dim, hidden_dim)
    w2, b2 = linear(k2, hidden_dim, hidden_dim)
    wa, ba = linear(k3, hidden_dim, action_dim)
    wv, bv = linear(k4, hidden_dim, 1)
    return dict(w1=w1, b1=b1, w2=w2, b2=b2, wa=wa, ba=ba, wv=wv, bv=bv)


def pad_and_fuse_params(raw, *, use_bf16=False):
    """Zero-pad hidden dim to 128 lanes and fuse action + value heads into one
    (128, 128) weight (cols [0, A) = action head, col A = value head).
    bf16 weights are valid on v5e/v6e/v7x (MXU takes bf16 natively; all
    post-matmul math stays f32)."""
    w1, b1 = raw["w1"], raw["b1"]
    w2, b2 = raw["w2"], raw["b2"]
    wa, ba = raw["wa"], raw["ba"]
    wv, bv = raw["wv"], raw["bv"]
    state_dim, hidden = w1.shape
    action_dim = wa.shape[1]
    hp = HEAD_PAD
    assert hidden <= hp and action_dim + 1 <= hp

    w1p = jnp.zeros((state_dim, hp), jnp.float32).at[:, :hidden].set(w1)
    b1p = jnp.zeros((1, hp), jnp.float32).at[:, :hidden].set(b1)
    w2p = jnp.zeros((hp, hp), jnp.float32).at[:hidden, :hidden].set(w2)
    b2p = jnp.zeros((1, hp), jnp.float32).at[:, :hidden].set(b2)

    wh = jnp.concatenate([wa, wv], axis=1)  # (hidden, A+1)
    bh = jnp.concatenate([ba, bv], axis=1)  # (1, A+1)
    whp = jnp.zeros((hp, hp), jnp.float32).at[:hidden, :action_dim + 1].set(wh)
    bhp = jnp.zeros((1, hp), jnp.float32).at[:, :action_dim + 1].set(bh)

    wdt = jnp.bfloat16 if use_bf16 else jnp.float32
    params = dict(w1=w1p.astype(wdt), b1=b1p, w2=w2p.astype(wdt), b2=b2p,
                  wh=whp.astype(wdt), bh=bhp)
    return params, action_dim


def _reference_forward(x, p):
    h1 = jnp.tanh(x @ p["w1"] + p["b1"])
    h2 = jnp.tanh(h1 @ p["w2"] + p["b2"])
    logits = h2 @ p["wa"] + p["ba"]
    probs = jax.nn.softmax(logits, axis=-1)
    values = h2 @ p["wv"] + p["bv"]
    return probs, values


if __name__ == "__main__":
    state_dim, action_dim, hidden_dim = 16, 8, 32

    key = jax.random.PRNGKey(0)
    kx, kx2, kp = jax.random.split(key, 3)
    raw = init_params(kp, state_dim, action_dim, hidden_dim)

    # --- small batch, f32 path (exact softmax divide -> tight tolerances) ---
    batch = 8
    x = jax.random.normal(kx, (batch, state_dim), jnp.float32)
    ref_probs, ref_values = _reference_forward(x, raw)

    params_f32, adim = pad_and_fuse_params(raw, use_bf16=False)
    probs, values = policy_network_forward(x, params_f32, action_dim=adim)
    jax.block_until_ready((probs, values))

    assert probs.shape == (batch, action_dim)
    assert values.shape == (batch, 1)
    assert jnp.allclose(values, ref_values, atol=1e-4, rtol=1e-4)
    assert jnp.allclose(probs, ref_probs, atol=1e-4, rtol=1e-4)
    assert jnp.allclose(jnp.sum(probs, axis=-1), 1.0, atol=1e-5)

    # --- non-tile-aligned batch: exercises partial last block + 2 grid steps ---
    batch2 = 50
    x2 = jax.random.normal(kx2, (batch2, state_dim), jnp.float32)
    ref_probs2, ref_values2 = _reference_forward(x2, raw)
    probs2, values2 = policy_network_forward(x2, params_f32, action_dim=adim)
    jax.block_until_ready((probs2, values2))
    assert probs2.shape == (batch2, action_dim)
    assert values2.shape == (batch2, 1)
    assert jnp.allclose(values2, ref_values2, atol=1e-4, rtol=1e-4)
    assert jnp.allclose(probs2, ref_probs2, atol=1e-4, rtol=1e-4)

    # --- bf16 MXU-input + bf16 output path (valid on v5e/v6e/v7x) ---
    params_bf16, _ = pad_and_fuse_params(raw, use_bf16=True)
    probs16, values16 = policy_network_forward(x, params_bf16, action_dim=adim)
    jax.block_until_ready((probs16, values16))
    assert jnp.allclose(probs16, ref_probs, atol=5e-2, rtol=5e-2)
    assert jnp.allclose(values16, ref_values, atol=5e-2, rtol=5e-2)
    assert jnp.allclose(jnp.sum(probs16, axis=-1), 1.0, atol=3e-2)

    print("KERNEL_OK")
</pallas_src>

<mosaic_0001>
module attributes {stable_mosaic.version = 11 : i64} {
  func.func @_policy_kernel(%arg0: i32, %arg1: memref<8x16xf32, #tpu.memory_space<vmem>>, %arg2: memref<16x128xf32, #tpu.memory_space<vmem>>, %arg3: memref<1x128xf32, #tpu.memory_space<vmem>>, %arg4: memref<128x128xf32, #tpu.memory_space<vmem>>, %arg5: memref<1x128xf32, #tpu.memory_space<vmem>>, %arg6: memref<128x128xf32, #tpu.memory_space<vmem>>, %arg7: memref<1x128xf32, #tpu.memory_space<vmem>>, %arg8: memref<8x128xf32, #tpu.memory_space<vmem>>) attributes {dimension_semantics = [#tpu.dimension_semantics<parallel>], iteration_bounds = array<i64: 1>, scalar_prefetch = 0 : i64, scratch_operands = 0 : i64, tpu.core_type = #tpu.core_type<tc>, window_params = [{transform_indices = @transform_0, window_bounds = array<i64: 8, 16>}, {pipeline_mode = #tpu.pipeline_mode<synchronous>, transform_indices = @transform_1, window_bounds = array<i64: 16, 128>}, {pipeline_mode = #tpu.pipeline_mode<synchronous>, transform_indices = @transform_2, window_bounds = array<i64: 1, 128>}, {pipeline_mode = #tpu.pipeline_mode<synchronous>, transform_indices = @transform_3, window_bounds = array<i64: 128, 128>}, {pipeline_mode = #tpu.pipeline_mode<synchronous>, transform_indices = @transform_4, window_bounds = array<i64: 1, 128>}, {pipeline_mode = #tpu.pipeline_mode<synchronous>, transform_indices = @transform_5, window_bounds = array<i64: 128, 128>}, {pipeline_mode = #tpu.pipeline_mode<synchronous>, transform_indices = @transform_6, window_bounds = array<i64: 1, 128>}, {transform_indices = @transform_7, window_bounds = array<i64: 8, 128>}]} {
    %c0 = arith.constant 0 : index
    %c0_0 = arith.constant 0 : index
    %0 = vector.load %arg3[%c0, %c0_0] : memref<1x128xf32, #tpu.memory_space<vmem>>, vector<1x128xf32>
    %c0_1 = arith.constant 0 : index
    %c0_2 = arith.constant 0 : index
    %1 = vector.load %arg5[%c0_1, %c0_2] : memref<1x128xf32, #tpu.memory_space<vmem>>, vector<1x128xf32>
    %c0_3 = arith.constant 0 : index
    %c0_4 = arith.constant 0 : index
    %2 = vector.load %arg7[%c0_3, %c0_4] : memref<1x128xf32, #tpu.memory_space<vmem>>, vector<1x128xf32>
    %c0_5 = arith.constant 0 : index
    %c0_6 = arith.constant 0 : index
    %3 = vector.load %arg1[%c0_5, %c0_6] : memref<8x16xf32, #tpu.memory_space<vmem>>, vector<8x16xf32>
    %c0_7 = arith.constant 0 : index
    %c0_8 = arith.constant 0 : index
    %4 = vector.load %arg2[%c0_7, %c0_8] : memref<16x128xf32, #tpu.memory_space<vmem>>, vector<16x128xf32>
    %cst = arith.constant dense<0.000000e+00> : vector<8x128xf32>
    %5 = tpu.matmul %3, %4, %cst {dimension_numbers = #tpu.dot_dimension_numbers<[1], [0], [0], [1], [0, 0, 1, 1], [], []>} : vector<8x16xf32>, vector<16x128xf32>, vector<8x128xf32> -> vector<8x128xf32>
    %6 = vector.broadcast %0 : vector<1x128xf32> to vector<8x128xf32>
    %7 = arith.addf %5, %6 : vector<8x128xf32>
    %8 = math.tanh %7 : vector<8x128xf32>
    %c0_9 = arith.constant 0 : index
    %c0_10 = arith.constant 0 : index
    %9 = vector.load %arg4[%c0_9, %c0_10] : memref<128x128xf32, #tpu.memory_space<vmem>>, vector<128x128xf32>
    %cst_11 = arith.constant dense<0.000000e+00> : vector<8x128xf32>
    %10 = tpu.matmul %8, %9, %cst_11 {dimension_numbers = #tpu.dot_dimension_numbers<[1], [0], [0], [1], [0, 0, 1, 1], [], []>} : vector<8x128xf32>, vector<128x128xf32>, vector<8x128xf32> -> vector<8x128xf32>
    %11 = vector.broadcast %1 : vector<1x128xf32> to vector<8x128xf32>
    %12 = arith.addf %10, %11 : vector<8x128xf32>
    %13 = math.tanh %12 : vector<8x128xf32>
    %c0_12 = arith.constant 0 : index
    %c0_13 = arith.constant 0 : index
    %14 = vector.load %arg6[%c0_12, %c0_13] : memref<128x128xf32, #tpu.memory_space<vmem>>, vector<128x128xf32>
    %cst_14 = arith.constant dense<0.000000e+00> : vector<8x128xf32>
    %15 = tpu.matmul %13, %14, %cst_14 {dimension_numbers = #tpu.dot_dimension_numbers<[1], [0], [0], [1], [0, 0, 1, 1], [], []>} : vector<8x128xf32>, vector<128x128xf32>, vector<8x128xf32> -> vector<8x128xf32>
    %16 = vector.broadcast %2 : vector<1x128xf32> to vector<8x128xf32>
    %17 = arith.addf %15, %16 : vector<8x128xf32>
    %18 = tpu.iota {dimensions = array<i32: 1>} : vector<1x128xi32>
    %c8_i32 = arith.constant 8 : i32
    %19 = vector.broadcast %c8_i32 : i32 to vector<1x128xi32>
    %20 = arith.cmpi slt, %18, %19 : vector<1x128xi32>
    %c8_i32_15 = arith.constant 8 : i32
    %21 = vector.broadcast %c8_i32_15 : i32 to vector<1x128xi32>
    %22 = arith.cmpi eq, %18, %21 : vector<1x128xi32>
    %cst_16 = arith.constant -1.000000e+30 : f32
    %23 = vector.shape_cast %20 : vector<1x128xi1> to vector<1x128xi1>
    %24 = vector.broadcast %23 : vector<1x128xi1> to vector<8x128xi1>
    %25 = vector.broadcast %cst_16 : f32 to vector<8x128xf32>
    %26 = arith.select %24, %17, %25 : vector<8x128xi1>, vector<8x128xf32>
    %cst_17 = arith.constant dense<0xFF800000> : vector<8xf32>
    %27 = vector.multi_reduction <maximumf>, %26, %cst_17 [1] : vector<8x128xf32> to vector<8xf32>
    %28 = vector.shape_cast %27 : vector<8xf32> to vector<8x1xf32>
    %29 = vector.broadcast %28 : vector<8x1xf32> to vector<8x128xf32>
    %30 = arith.subf %26, %29 : vector<8x128xf32>
    %31 = math.exp %30 : vector<8x128xf32>
    %cst_18 = arith.constant dense<0.000000e+00> : vector<8xf32>
    %32 = vector.multi_reduction <add>, %31, %cst_18 [1] : vector<8x128xf32> to vector<8xf32>
    %33 = vector.shape_cast %32 : vector<8xf32> to vector<8x1xf32>
    %34 = vector.broadcast %33 : vector<8x1xf32> to vector<8x128xf32>
    %35 = arith.divf %31, %34 : vector<8x128xf32>
    %cst_19 = arith.constant 0.000000e+00 : f32
    %36 = vector.shape_cast %22 : vector<1x128xi1> to vector<1x128xi1>
    %37 = vector.broadcast %36 : vector<1x128xi1> to vector<8x128xi1>
    %38 = vector.broadcast %cst_19 : f32 to vector<8x128xf32>
    %39 = arith.select %37, %17, %38 : vector<8x128xi1>, vector<8x128xf32>
    %40 = vector.shape_cast %20 : vector<1x128xi1> to vector<1x128xi1>
    %41 = vector.broadcast %40 : vector<1x128xi1> to vector<8x128xi1>
    %42 = arith.select %41, %35, %39 : vector<8x128xi1>, vector<8x128xf32>
    %c0_20 = arith.constant 0 : index
    %c0_21 = arith.constant 0 : index
    %43 = vector.load %arg8[%c0_20, %c0_21] : memref<8x128xf32, #tpu.memory_space<vmem>>, vector<8x128xf32>
    tpu.vector_store %arg8[%c0_20, %c0_21], %42 {strides = array<i32>} : memref<8x128xf32, #tpu.memory_space<vmem>>, vector<8x128xf32>,
    return
  }
  func.func @transform_0(%arg0: i32) -> (i32, i32) {
    %c0_i32 = arith.constant 0 : i32
    %c0_i32_0 = arith.constant 0 : i32
    return %arg0, %c0_i32 : i32, i32
  }
  func.func @transform_1(%arg0: i32) -> (i32, i32) {
    %c0_i32 = arith.constant 0 : i32
    %c0_i32_0 = arith.constant 0 : i32
    %c0_i32_1 = arith.constant 0 : i32
    return %c0_i32, %c0_i32_0 : i32, i32
  }
  func.func @transform_2(%arg0: i32) -> (i32, i32) {
    %c0_i32 = arith.constant 0 : i32
    %c0_i32_0 = arith.constant 0 : i32
    %c0_i32_1 = arith.constant 0 : i32
    return %c0_i32, %c0_i32_0 : i32, i32
  }
  func.func @transform_3(%arg0: i32) -> (i32, i32) {
    %c0_i32 = arith.constant 0 : i32
    %c0_i32_0 = arith.constant 0 : i32
    %c0_i32_1 = arith.constant 0 : i32
    return %c0_i32, %c0_i32_0 : i32, i32
  }
  func.func @transform_4(%arg0: i32) -> (i32, i32) {
    %c0_i32 = arith.constant 0 : i32
    %c0_i32_0 = arith.constant 0 : i32
    %c0_i32_1 = arith.constant 0 : i32
    return %c0_i32, %c0_i32_0 : i32, i32
  }
  func.func @transform_5(%arg0: i32) -> (i32, i32) {
    %c0_i32 = arith.constant 0 : i32
    %c0_i32_0 = arith.constant 0 : i32
    %c0_i32_1 = arith.constant 0 : i32
    return %c0_i32, %c0_i32_0 : i32, i32
  }
  func.func @transform_6(%arg0: i32) -> (i32, i32) {
    %c0_i32 = arith.constant 0 : i32
    %c0_i32_0 = arith.constant 0 : i32
    %c0_i32_1 = arith.constant 0 : i32
    return %c0_i32, %c0_i32_0 : i32, i32
  }
  func.func @transform_7(%arg0: i32) -> (i32, i32) {
    %c0_i32 = arith.constant 0 : i32
    %c0_i32_0 = arith.constant 0 : i32
    return %arg0, %c0_i32 : i32, i32
  }
}

</mosaic_0001>

<bundles_post_ra>
// kernel: policy_network_forward.1
= control target key start
LH: loop header
LB: loop body
LE: loop exit
PB: predicated region body
PF: predicated region fallthrough
CT: control target
= control target key end

     0   :  { %12 = vsyncpa [#allocation3], 0  ;;  %s799_s0 = inlined_call_operand.hbm [shape: f32[8,16], index: 0, kind: input, shape index: {}]   ;;  %s800_s1 = inlined_call_operand.hbm [shape: f32[16,128], index: 1, kind: input, shape index: {}]   ;;  %s801_s2 = inlined_call_operand.vmem [shape: f32[1,128], index: 2, kind: input, shape index: {}]   ;;  %s802_s3 = inlined_call_operand.hbm [shape: f32[128,128], index: 3, kind: input, shape index: {}]   ;;  %s803_s4 = inlined_call_operand.vmem [shape: f32[1,128], index: 4, kind: input, shape index: {}]   ;;  %s804_s5 = inlined_call_operand.hbm [shape: f32[128,128], index: 5, kind: input, shape index: {}]   ;;  %s805_s6 = inlined_call_operand.vmem [shape: f32[1,128], index: 6, kind: input, shape index: {}]   ;;  %s806_s7 = inlined_call_operand.vmem [shape: f32[8,128], index: 7, kind: output, shape index: {}]  }
   0x1   :  { %13 = vsyncpa [#allocation5], 0 }
   0x2   :  { %14 = vsyncpa [#allocation8], 0  ;;  %s659_s24 = smov [#allocation4]   ;;  %s565_s28 = scalar_lea.hbm %s800_s1, 256 }
   0x3   :  { %s30_s25 = sshll.u32 %s659_s24, 4  ;;  %p566_p0 = scmp.ne.s32.totalorder %s800_s1, %s565_s28  ;;  %s31_s25 = int_to_ptr.vmem [resolvable:$true] %s30_s25 }
   0x4   :  { %p569_p1 = scmp.lt.u32.totalorder %s565_s28, %s800_s1 }
   0x6   :  { %p571_p2 = pnand %p569_p1, %p566_p0 }
   0x8   :  { %574 = shalt.err (!%p571_p2)
}
   0x9   :  { %s575_s10 = scalar_lea.vmem %s31_s25, 256  ;;  %p580_p4 = scmp.lt.s32.totalorder %s31_s25, %s31_s25 }
   0xa   :  { %p576_p3 = scmp.ne.s32.totalorder %s31_s25, %s575_s10  ;;  %p581_p5 = scmp.lt.s32.totalorder %s575_s10, %s575_s10 }
   0xc   :  { %p582_p6 = por %p581_p5, %p580_p4 }
   0xe   :  { %p583_p7 = pnand %p582_p6, %p576_p3 }
  0x10   :  { %586 = shalt.err (!%p583_p7)
}
  0x11   :  { %s660_s11 = smov 128   ;;  %s661_s12 = smov 8  }
  0x12   :  { %36 = dma.hbm_to_vmem [thread:$0]  %s800_s1, 256, %s31_s25, [#allocation5], %s660_s11, %s660_s11, %s661_s12  }
  0x13   :  { %s662_s15 = smov [#allocation2]   ;;  %s663_s17 = smov [#allocation6]  }
  0x14   :  { %s21_s16 = sshll.u32 %s662_s15, 4  ;;  %s44_s18 = sshll.u32 %s663_s17, 4  ;;  %s22_s16 = int_to_ptr.vmem [resolvable:$true] %s21_s16  ;;  %s45_s18 = int_to_ptr.vmem [resolvable:$true] %s44_s18 }
  0x15   :  { %s587_s21 = scalar_lea.hbm %s799_s0, 128 }
  0x16   :  { %p588_p8 = scmp.ne.s32.totalorder %s799_s0, %s587_s21  ;;  %p591_p9 = scmp.lt.u32.totalorder %s587_s21, %s799_s0 }
  0x18   :  { %p593_p10 = pnand %p591_p9, %p588_p8 }
  0x1a   :  { %596 = shalt.err (!%p593_p10)
}
  0x1b   :  { %s597_s1 = scalar_lea.vmem %s22_s16, 128  ;;  %p602_p12 = scmp.lt.s32.totalorder %s22_s16, %s22_s16 }
  0x1c   :  { %p598_p11 = scmp.ne.s32.totalorder %s22_s16, %s597_s1  ;;  %p603_p13 = scmp.lt.s32.totalorder %s597_s1, %s597_s1 }
  0x1e   :  { %p604_p0 = por %p603_p13, %p602_p12 }
  0x20   :  { %p605_p1 = pnand %p604_p0, %p598_p11 }
  0x22   :  { %608 = shalt.err (!%p605_p1)
}
  0x23   :  { %24 = dma.hbm_to_vmem [thread:$0]  %s799_s0, 128, %s22_s16, [#allocation3]  }
  0x24   :  { %s609_s30 = scalar_lea.hbm %s802_s3, 2048 }
  0x25   :  { %p610_p2 = scmp.ne.s32.totalorder %s802_s3, %s609_s30  ;;  %p613_p3 = scmp.lt.u32.totalorder %s609_s30, %s802_s3 }
  0x27   :  { %p615_p4 = pnand %p613_p3, %p610_p2 }
  0x29   :  { %618 = shalt.err (!%p615_p4)
}
  0x2a   :  { %s619_s14 = scalar_lea.vmem %s45_s18, 2048  ;;  %p624_p6 = scmp.lt.s32.totalorder %s45_s18, %s45_s18 }
  0x2b   :  { %p620_p5 = scmp.ne.s32.totalorder %s45_s18, %s619_s14  ;;  %p625_p7 = scmp.lt.s32.totalorder %s619_s14, %s619_s14 }
  0x2d   :  { %p626_p8 = por %p625_p7, %p624_p6 }
  0x2f   :  { %p627_p9 = pnand %p626_p8, %p620_p5 }
  0x31   :  { %630 = shalt.err (!%p627_p9)
}
  0x32   :  { %50 = dma.hbm_to_vmem [thread:$0]  %s802_s3, 2048, %s45_s18, [#allocation5], %s660_s11, %s660_s11, %s661_s12  }
  0x33   :  { %s664_s16 = smov [#allocation7]   ;;  %s631_s21 = scalar_lea.hbm %s804_s5, 2048 }
  0x34   :  { %s58_s17 = sshll.u32 %s664_s16, 4  ;;  %p632_p10 = scmp.ne.s32.totalorder %s804_s5, %s631_s21  ;;  %s59_s17 = int_to_ptr.vmem [resolvable:$true] %s58_s17 }
  0x35   :  { %p635_p11 = scmp.lt.u32.totalorder %s631_s21, %s804_s5 }
  0x37   :  { %p637_p12 = pnand %p635_p11, %p632_p10 }
  0x39   :  { %640 = shalt.err (!%p637_p12)
}
  0x3a   :  { %s641_s1 = scalar_lea.vmem %s59_s17, 2048  ;;  %p646_p0 = scmp.lt.s32.totalorder %s59_s17, %s59_s17 }
  0x3b   :  { %p642_p13 = scmp.ne.s32.totalorder %s59_s17, %s641_s1  ;;  %p647_p1 = scmp.lt.s32.totalorder %s641_s1, %s641_s1 }
  0x3d   :  { %p648_p2 = por %p647_p1, %p646_p0 }
  0x3f   :  { %p649_p3 = pnand %p648_p2, %p642_p13 }
  0x41   :  { %652 = shalt.err (!%p649_p3)
}
  0x42   :  { %64 = dma.hbm_to_vmem [thread:$0]  %s804_s5, 2048, %s59_s17, [#allocation8], %s660_s11, %s660_s11, %s661_s12  }
  0x43   :  { %653 = dma.done.wait [#allocation3], 128  }
  0x44   :  { %654 = vsyncadd [#allocation3], 4294967168 }
  0x45   :  { %655 = dma.done.wait [#allocation5], 2304  }
  0x46   :  { %656 = vsyncadd [#allocation5], 4294964992 }
  0x47   :  { %657 = dma.done.wait [#allocation8], 2048  }
  0x48   :  { %658 = vsyncadd [#allocation8], 4294965248  ;;  %v665_v0 = vmov 0.0|0.0   ;;  %vm666_vm0 = vmmov 0   ;;  %v667_v1 = vmov 0.0   ;;  %v83_v2 = vld [vmem:[#allocation4] sm:$0xff] }
  0x49   :  { %497 = vmatprep.subr.bf16.mxu0 %v665_v0  ;;  %424 = vmatprep.mubr.msk.f32.mxu0 %vm666_vm0, %v667_v1  ;;  %v84_v3 = vld [vmem:[#allocation4 + $0x8] sm:$0xff]  ;;  %v166_v5 = vld [vmem:[#allocation6] sm:$0xff]  ;;  %v167_v6 = vld [vmem:[#allocation6 + $0x8] sm:$0xff]  ;;  %vm91_vm1 = vcmask 130048  }
  0x4a   :  { %500 = vmatprep.subr.bf16.mxu1 %v665_v0  ;;  %459 = vmatprep.mubr.msk.f32.mxu1 %vm666_vm0, %v667_v1  ;;  %v498_v4 = vpack.c.bf16 %v84_v3, %v83_v2  ;;  %v168_v7 = vld [vmem:[#allocation6 + $0x10] sm:$0xff]  ;;  %v501_v8 = vpack.c.bf16 %v167_v6, %v166_v5  ;;  %v169_v9 = vld [vmem:[#allocation6 + $0x18] sm:$0xff]  ;;  %v82_v10 = vld [vmem:[#allocation2] sm:$0xff] }
  0x4b   :  { %v504_v11 = vpack.c.bf16 %v169_v9, %v168_v7  ;;  %v170_v12 = vld [vmem:[#allocation6 + $0x20] sm:$0xff]  ;;  %v171_v13 = vld [vmem:[#allocation6 + $0x28] sm:$0xff]  ;;  %v172_v15 = vld [vmem:[#allocation6 + $0x30] sm:$0xff] }
  0x4c   :  { %499 = vmatpush3.bf16.msra.mxu0 %v498_v4  ;;  %502 = vmatpush3.bf16.msra.mxu1 %v501_v8  ;;  %v507_v14 = vpack.c.bf16 %v171_v13, %v170_v12  ;;  %v173_v16 = vld [vmem:[#allocation6 + $0x38] sm:$0xff]  ;;  %v174_v18 = vld [vmem:[#allocation6 + $0x40] sm:$0xff]  ;;  %v175_v19 = vld [vmem:[#allocation6 + $0x48] sm:$0xff] }
  0x4d   :  { %524 = vmatprep.subr.bf16.mxu0 %v665_v0  ;;  %503 = vmatprep.subr.bf16.mxu1 %v665_v0  ;;  %v510_v17 = vpack.c.bf16 %v173_v16, %v172_v15  ;;  %v513_v20 = vpack.c.bf16 %v175_v19, %v174_v18  ;;  %v176_v21 = vld [vmem:[#allocation6 + $0x50] sm:$0xff]  ;;  %v177_v22 = vld [vmem:[#allocation6 + $0x58] sm:$0xff]  ;;  %v178_v24 = vld [vmem:[#allocation6 + $0x60] sm:$0xff] }
  0x4e   :  { %v516_v23 = vpack.c.bf16 %v177_v22, %v176_v21  ;;  %v179_v25 = vld [vmem:[#allocation6 + $0x68] sm:$0xff]  ;;  %v180_v27 = vld [vmem:[#allocation6 + $0x70] sm:$0xff]  ;;  %v181_v28 = vld [vmem:[#allocation6 + $0x78] sm:$0xff] }
  0x4f   :  { %425 = vmatmul.mubr.msk.f32.vlgmr.msra.gmra.mrb[0].mxu0 %vm91_vm1, %v82_v10  ;;  %v519_v26 = vpack.c.bf16 %v179_v25, %v178_v24  ;;  %v522_v29 = vpack.c.bf16 %v181_v28, %v180_v27  ;;  %v259_v30 = vld [vmem:[#allocation7] sm:$0xff]  ;;  %v260_v31 = vld [vmem:[#allocation7 + $0x8] sm:$0xff]  ;;  %v261_v32 = vld [vmem:[#allocation7 + $0x10] sm:$0xff] }
  0x50   :  { %494 = vmatprep.mubr.msk.f32.mxu0 %vm666_vm0, %v667_v1  ;;  %505 = vmatpush3.bf16.msra.mxu1 %v504_v11  ;;  %v525_v33 = vpack.c.bf16 %v260_v31, %v259_v30  ;;  %v262_v34 = vld [vmem:[#allocation7 + $0x18] sm:$0xff]  ;;  %v263_v36 = vld [vmem:[#allocation7 + $0x20] sm:$0xff]  ;;  %v264_v37 = vld [vmem:[#allocation7 + $0x28] sm:$0xff]  ;;  %v351_v1 = vlaneseq }
  0x51   :  { %506 = vmatprep.subr.bf16.mxu1 %v665_v0  ;;  %v528_v35 = vpack.c.bf16 %v262_v34, %v261_v32  ;;  %v531_v38 = vpack.c.bf16 %v264_v37, %v263_v36  ;;  %v265_v39 = vld [vmem:[#allocation7 + $0x30] sm:$0xff]  ;;  %v266_v40 = vld [vmem:[#allocation7 + $0x38] sm:$0xff]  ;;  %v267_v42 = vld [vmem:[#allocation7 + $0x40] sm:$0xff] }
  0x52   :  { %526 = vmatpush3.bf16.msra.mxu0 %v525_v33  ;;  %v534_v41 = vpack.c.bf16 %v266_v40, %v265_v39  ;;  %v268_v43 = vld [vmem:[#allocation7 + $0x48] sm:$0xff]  ;;  %v379_v45 = vld [vmem:[%s801_s2] ss:$0 sm:$0xff]  ;;  %v269_v50 = vld [vmem:[#allocation7 + $0x50] sm:$0xff]  ;;  %v352_v2 = vand.u32 127, %v351_v1 }
  0x53   :  { %527 = vmatprep.subr.bf16.mxu0 %v665_v0  ;;  %v537_v44 = vpack.c.bf16 %v268_v43, %v267_v42  ;;  %v270_v51 = vld [vmem:[#allocation7 + $0x58] sm:$0xff]  ;;  %v271_v53 = vld [vmem:[#allocation7 + $0x60] sm:$0xff]  ;;  %v272_v54 = vld [vmem:[#allocation7 + $0x68] sm:$0xff] }
  0x54   :  { %508 = vmatpush3.bf16.msra.mxu1 %v507_v14  ;;  %v540_v52 = vpack.c.bf16 %v270_v51, %v269_v50  ;;  %v543_v55 = vpack.c.bf16 %v272_v54, %v271_v53  ;;  %v273_v56 = vld [vmem:[#allocation7 + $0x70] sm:$0xff]  ;;  %v274_v57 = vld [vmem:[#allocation7 + $0x78] sm:$0xff]  ;;  %v381_v59 = vld [vmem:[%s803_s4] ss:$0 sm:$0xff]  ;;  %vm354_vm2 = vcmp.eq.s32.totalorder %v352_v2, 8  ;;  %vm353_vm3 = vcmp.lt.s32.totalorder %v352_v2, 8 }
  0x55   :  { %509 = vmatprep.subr.bf16.mxu1 %v665_v0  ;;  %v546_v58 = vpack.c.bf16 %v274_v57, %v273_v56  ;;  %v382_v3 = vld [vmem:[%s805_s6] ss:$0 sm:$0xff] }
  0x56   :  { %529 = vmatpush3.bf16.msra.mxu0 %v528_v35 }
  0x57   :  { %530 = vmatprep.subr.bf16.mxu0 %v665_v0 }
  0x58   :  { %511 = vmatpush3.bf16.msra.mxu1 %v510_v17 }
  0x59   :  { %512 = vmatprep.subr.bf16.mxu1 %v665_v0 }
  0x5a   :  { %532 = vmatpush3.bf16.msra.mxu0 %v531_v38 }
  0x5b   :  { %533 = vmatprep.subr.bf16.mxu0 %v665_v0 }
  0x5c   :  { %514 = vmatpush3.bf16.msra.mxu1 %v513_v20 }
  0x5d   :  { %515 = vmatprep.subr.bf16.mxu1 %v665_v0 }
  0x5e   :  { %535 = vmatpush3.bf16.msra.mxu0 %v534_v41 }
  0x5f   :  { %536 = vmatprep.subr.bf16.mxu0 %v665_v0 }
  0x60   :  { %517 = vmatpush3.bf16.msra.mxu1 %v516_v23 }
  0x61   :  { %518 = vmatprep.subr.bf16.mxu1 %v665_v0 }
  0x62   :  { %538 = vmatpush3.bf16.msra.mxu0 %v537_v44 }
  0x63   :  { %539 = vmatprep.subr.bf16.mxu0 %v665_v0 }
  0x64   :  { %520 = vmatpush3.bf16.msra.mxu1 %v519_v26 }
  0x65   :  { %521 = vmatprep.subr.bf16.mxu1 %v665_v0 }
  0x66   :  { %541 = vmatpush3.bf16.msra.mxu0 %v540_v52 }
  0x67   :  { %542 = vmatprep.subr.bf16.mxu0 %v665_v0 }
  0x68   :  { %523 = vmatpush3.bf16.msra.mxu1 %v522_v29 }
  0x6a   :  { %544 = vmatpush3.bf16.msra.mxu0 %v543_v55 }
  0x6b   :  { %545 = vmatprep.subr.bf16.mxu0 %v665_v0 }
  0x6e   :  { %547 = vmatpush3.bf16.msra.mxu0 %v546_v58 }
 0x122   :  { %v161_v46 = vpop.f32.mrb[0].mxu0 }
 0x123   :  { %v162_v47 = vadd.f32 %v379_v45, %v161_v46  ;;  %v426_v48 = vpop.f32.mrb[1].mxu0 }
 0x125   :  { %557 = vtanh.f32 %v162_v47 }
 0x12f   :  { %v558_v49 = vpop.eup %557 }
 0x130   :  { %460 = vmatmul.mubr.f32.vlgmr.msra.gmra.mrb[0].mxu1 %v558_v49 }
 0x203   :  { %v254_v60 = vpop.f32.mrb[0].mxu1 }
 0x204   :  { %v255_v61 = vadd.f32 %v381_v59, %v254_v60  ;;  %v461_v62 = vpop.f32.mrb[1].mxu1 }
 0x206   :  { %559 = vtanh.f32 %v255_v61 }
 0x210   :  { %v560_v63 = vpop.eup %559 }
 0x211   :  { %495 = vmatmul.mubr.f32.vlgmr.msra.gmra.mrb[2].mxu0 %v560_v63 }
 0x2e4   :  { %v347_v4 = vpop.f32.mrb[2].mxu0 }
 0x2e5   :  { %v348_v0 = vadd.f32 %v382_v3, %v347_v4  ;;  %v496_v5 = vpop.f32.mrb[3].mxu0 }
 0x2e7   :  { %v369_v6 = vsel %vm354_vm2, %v348_v0, 0.0  ;;  %v357_v7 = vsel %vm353_vm3, %v348_v0, -1e+30 }
 0x2e8   :  { %358 = vmax.xlane.f32.xlu0 %v357_v7 }
 0x375   :  { %v359_v8 = vpop.xlane.xlu0 %358 }
 0x376   :  { %v360_v9 = vsub.f32 %v357_v7, %v359_v8 }
 0x378   :  { %v361_v10 = vmul.f32 1.442695, %v360_v9 }
 0x37a   :  { %561 = vpow2.f32 %v361_v10 }
 0x384   :  { %v562_v11 = vpop.eup %561 }
 0x385   :  { %363 = vadd.xlane.f32.xlu0 %v562_v11 }
 0x412   :  { %v364_v12 = vpop.xlane.xlu0 %363 }
 0x413   :  { %563 = vrcp.f32 %v364_v12 }
 0x41d   :  { %v564_v13 = vpop.eup %563 }
 0x41e   :  { %v366_v14 = vmul.f32 %v564_v13, %v562_v11 }
 0x420   :  { %v370_v15 = vsel %vm353_vm3, %v366_v14, %v369_v6 }
 0x421   :  { %371 = vst [vmem:[%s806_s7] sm:$0xff] %v370_v15 }
 0x422   :  { %376 = vsyncpa [#allocation3], 1 }
 0x423   :  { %377 = vsyncpa [#allocation5], 1 }
 0x424   :  { %378 = vsyncpa [#allocation8], 1 }

</bundles_post_ra>
